<compile_context>
chip_gen: v5e
topology: v5e:2x2
jax: 0.10.0
libtpu: 0.0.40
codegen_flags: <defaults>
</compile_context>

<pallas_src>
import functools
import inspect

import jax
import jax.numpy as jnp
from jax.experimental import pallas as pl
from jax.experimental.pallas import tpu as pltpu

EPS = 1e-5          # nn.LayerNorm default eps
_FFN_CHUNK = 2048   # max cols of W1 / rows of W2 processed per FFN K-chunk


def _supports_single_buffer():
    try:
        return (hasattr(pl, "Buffered")
                and "pipeline_mode" in inspect.signature(pl.BlockSpec).parameters)
    except (TypeError, ValueError):
        return False


_HAS_SINGLE_BUFFER = _supports_single_buffer()


def _layernorm(x, gamma, beta):
    xf = x.astype(jnp.float32)
    mu = jnp.mean(xf, axis=-1, keepdims=True)
    var = jnp.mean(jnp.square(xf - mu), axis=-1, keepdims=True)
    return (xf - mu) * jax.lax.rsqrt(var + EPS) * gamma + beta


def block_kernel(x_ref,
                 wq_ref, wk_ref, wv_ref,            # fused (C, C): head h in cols [h*D,(h+1)*D)
                 wproj_ref, bproj_ref,              # (C, C), (1, C)
                 ln1g_ref, ln1b_ref,                # (1, C)
                 ln2g_ref, ln2b_ref,                # (1, C)
                 w1_ref, b1_ref,                    # (C, 4C), (1, 4C)
                 w2_ref, b2_ref,                    # (4C, C), (1, C)
                 out_ref,
                 *, n_head, matmul_dtype):
    Bt, T, C = x_ref.shape
    H = n_head
    D = C // H
    M = Bt * T
    md = matmul_dtype
    approx_recip = jnp.dtype(md) != jnp.dtype(jnp.float32)

    x = x_ref[...]                                   # keep input dtype (no forced f32 slab)
    x2 = x.reshape(M, C)                             # leading-dim merge; lane layout intact

    def mm(a, w):                                    # MXU matmul, f32 accumulation
        return jnp.dot(a.astype(md), w, preferred_element_type=jnp.float32)

    # ---- LayerNorm 1 (f32 stats) ----
    xn = _layernorm(x2, ln1g_ref[...], ln1b_ref[...])

    # ---- fused whole-C K/Q/V projections (one big lane-dense matmul each) ----
    q = mm(xn, wq_ref[...]).reshape(Bt, T, C)
    k = mm(xn, wk_ref[...]).reshape(Bt, T, C)
    v = mm(xn, wv_ref[...]).reshape(Bt, T, C)

    # ---- causal additive bias, hoisted out of the head loop ----
    # NOTE: reference scales by C**-0.5 where C = n_embed (NOT head_size).
    scale = C ** (-0.5)
    row = jax.lax.broadcasted_iota(jnp.int32, (T, T), 0)
    col = jax.lax.broadcasted_iota(jnp.int32, (T, T), 1)
    causal_bias = jnp.where(col <= row, 0.0, -jnp.inf)[None]     # (1, T, T)

    # ---- multi-head causal self-attention ----
    # Each head's PV output is projected through its own D-row slab of W_proj and
    # accumulated: attn @ Wproj == sum_h head_h @ Wproj[h*D:(h+1)*D, :]  (no concat).
    # TODO(synk): lax.fori_loop(..., unroll=True) if H grows large (bounded live ranges).
    sa = None
    for h in range(H):                               # H small & static
        sl = slice(h * D, (h + 1) * D)
        s = jnp.einsum('btd,bsd->bts',
                       q[:, :, sl].astype(md), k[:, :, sl].astype(md),
                       preferred_element_type=jnp.float32) * scale + causal_bias
        s = s - jnp.max(s, axis=-1, keepdims=True)   # safe: diagonal always unmasked
        p = jnp.exp(s)
        p = p * pl.reciprocal(jnp.sum(p, axis=-1, keepdims=True), approx=approx_recip)
        # attention-dropout is identity at inference
        pv = jnp.einsum('bts,bsd->btd', p.astype(md), v[:, :, sl].astype(md),
                        preferred_element_type=jnp.float32)
        part = jnp.dot(pv.reshape(M, D).astype(md), wproj_ref[sl, :],
                       preferred_element_type=jnp.float32)
        sa = part if sa is None else sa + part
    sa = sa + bproj_ref[...]

    x1 = x2.astype(jnp.float32) + sa                 # residual 1 (f32)

    # ---- LayerNorm 2 + FeedForward, tiled over the 4C hidden dim ----
    xn2 = _layernorm(x1, ln2g_ref[...], ln2b_ref[...])
    F4 = w1_ref.shape[1]
    step = min(F4, _FFN_CHUNK)
    ff = None
    for c0 in range(0, F4, step):
        c1 = min(c0 + step, F4)
        hid = jnp.maximum(mm(xn2, w1_ref[:, c0:c1]) + b1_ref[:, c0:c1], 0.0)  # ReLU
        part = mm(hid, w2_ref[c0:c1, :])
        ff = part if ff is None else ff + part
    ff = ff + b2_ref[...]
    # ffd dropout is identity at inference

    out_ref[...] = (x1 + ff).reshape(Bt, T, C).astype(out_ref.dtype)          # residual 2


def _vmem_estimate(bt, T, C, H, x_itemsize, w_itemsize):
    """Rough per-grid-step VMEM bytes: IO double-buffers + single-buffered weights
    + dominant f32 intermediates (q/k/v, LN/residual slabs, scores, FFN hidden chunk)."""
    f32 = 4
    M = bt * T
    weights = 12 * C * C * w_itemsize                 # qkv(3C^2)+proj(C^2)+w1(4C^2)+w2(4C^2)
    biases = 10 * C * f32
    io = 2 * 2 * bt * T * C * x_itemsize              # double-buffered x-in and out blocks
    acts = (7 * M * C                                 # q, k, v + xn/x1/xn2/sa-ff slabs
            + 2 * bt * T * T                          # per-head scores + probs
            + M * min(4 * C, _FFN_CHUNK)) * f32       # FFN hidden chunk
    return weights + biases + io + acts


@functools.partial(jax.jit, static_argnames=("bt", "matmul_dtype"))
def block_forward(x, params, *, bt=None, matmul_dtype=jnp.float32):
    B, T, C = x.shape
    H, _, D = params["wk"].shape
    assert H * D == C

    md = jnp.dtype(matmul_dtype)
    w_itemsize = md.itemsize
    x_itemsize = jnp.dtype(x.dtype).itemsize

    # --- bt auto-selection: largest batch tile within a v7x-safe budget, but keep
    # >=2 grid steps so the "parallel" axis can shard across v7x's 2 TensorCores. ---
    if bt is None:
        budget = 40 * 2**20
        cands = [d for d in range(B, 0, -1) if B % d == 0]
        if B >= 2:
            cands = [d for d in cands if B // d >= 2] or [1]
        fitting = [d for d in cands
                   if _vmem_estimate(d, T, C, H, x_itemsize, w_itemsize) <= budget]
        if fitting:
            aligned = [d for d in fitting if (d * T) % 256 == 0]  # MXU-tile-aligned M
            bt = aligned[0] if aligned else fitting[0]
        else:
            # TODO(synk): flash-tile attention / stream weights if even bt=1 is too big.
            bt = cands[-1]
    assert B % bt == 0

    vmem_limit = int(min(max(_vmem_estimate(bt, T, C, H, x_itemsize, w_itemsize) * 3 // 2,
                             32 * 2**20),
                         64 * 2**20))                 # stays within v7x physical VMEM

    # Fuse per-head (C, D) projection weights into whole-C (C, C) matrices (column
    # block h == head h, matching torch.cat order) and pre-cast to matmul_dtype.
    def fuse(w):                                      # (H, C, D) -> (C, H*D)
        return jnp.transpose(w, (1, 0, 2)).reshape(C, H * D)

    wq_f = fuse(params["wq"]).astype(md)
    wk_f = fuse(params["wk"]).astype(md)
    wv_f = fuse(params["wv"]).astype(md)
    wproj = params["wproj"].astype(md)
    w1 = params["w1"].astype(md)
    w2 = params["w2"].astype(md)

    def const_spec(shape):                            # constant block -> single buffer
        nd = len(shape)
        idx = lambda b, _nd=nd: (0,) * _nd
        if _HAS_SINGLE_BUFFER:
            return pl.BlockSpec(shape, idx, pipeline_mode=pl.Buffered(1))
        return pl.BlockSpec(shape, idx)

    grid_spec = pltpu.PrefetchScalarGridSpec(
        num_scalar_prefetch=0,
        grid=(B // bt,),
        in_specs=[
            pl.BlockSpec((bt, T, C), lambda b: (b, 0, 0)),          # x
            const_spec((C, C)), const_spec((C, C)), const_spec((C, C)),   # fused wq, wk, wv
            const_spec((C, C)), const_spec((1, C)),                 # proj W, b
            const_spec((1, C)), const_spec((1, C)),                 # ln1 gamma, beta
            const_spec((1, C)), const_spec((1, C)),                 # ln2 gamma, beta
            const_spec((C, 4 * C)), const_spec((1, 4 * C)),         # ffn W1, b1
            const_spec((4 * C, C)), const_spec((1, C)),             # ffn W2, b2
        ],
        out_specs=pl.BlockSpec((bt, T, C), lambda b: (b, 0, 0)),
    )

    kernel = functools.partial(block_kernel, n_head=H, matmul_dtype=matmul_dtype)

    return pl.pallas_call(
        kernel,
        out_shape=jax.ShapeDtypeStruct((B, T, C), x.dtype),
        grid_spec=grid_spec,
        compiler_params=pltpu.CompilerParams(
            dimension_semantics=("parallel",),        # batch blocks independent
            vmem_limit_bytes=vmem_limit),
    )(x,
      wq_f, wk_f, wv_f,
      wproj, params["bproj"],
      params["ln1_g"], params["ln1_b"],
      params["ln2_g"], params["ln2_b"],
      w1, params["b1"],
      w2, params["b2"])


def reference_forward(x, p):
    """Pure-JAX reference matching the PyTorch module semantics (eval mode)."""
    B, T, C = x.shape
    H = p["wk"].shape[0]
    xn = _layernorm(x, p["ln1_g"][0], p["ln1_b"][0])
    heads = []
    tril = jnp.tril(jnp.ones((T, T), dtype=bool))
    for h in range(H):
        k = xn @ p["wk"][h]
        q = xn @ p["wq"][h]
        v = xn @ p["wv"][h]
        wei = (q @ jnp.swapaxes(k, -2, -1)) * (C ** -0.5)
        wei = jnp.where(tril, wei, -jnp.inf)
        wei = jax.nn.softmax(wei, axis=-1)
        heads.append(wei @ v)
    attn = jnp.concatenate(heads, axis=-1)
    x1 = x + attn @ p["wproj"] + p["bproj"][0]
    xn2 = _layernorm(x1, p["ln2_g"][0], p["ln2_b"][0])
    ff = jnp.maximum(xn2 @ p["w1"] + p["b1"][0], 0.0) @ p["w2"] + p["b2"][0]
    return x1 + ff


def make_params(key, n_embed, n_head):
    head_size = n_embed // n_head
    ks = jax.random.split(key, 8)
    s = 0.02
    return {
        "wk": jax.random.normal(ks[0], (n_head, n_embed, head_size), jnp.float32) * s,
        "wq": jax.random.normal(ks[1], (n_head, n_embed, head_size), jnp.float32) * s,
        "wv": jax.random.normal(ks[2], (n_head, n_embed, head_size), jnp.float32) * s,
        "wproj": jax.random.normal(ks[3], (n_embed, n_embed), jnp.float32) * s,
        "bproj": jax.random.normal(ks[4], (1, n_embed), jnp.float32) * s,
        "ln1_g": jnp.ones((1, n_embed), jnp.float32),
        "ln1_b": jnp.zeros((1, n_embed), jnp.float32),
        "ln2_g": jnp.ones((1, n_embed), jnp.float32),
        "ln2_b": jnp.zeros((1, n_embed), jnp.float32),
        "w1": jax.random.normal(ks[5], (n_embed, 4 * n_embed), jnp.float32) * s,
        "b1": jax.random.normal(ks[6], (1, 4 * n_embed), jnp.float32) * s,
        "w2": jax.random.normal(ks[7], (4 * n_embed, n_embed), jnp.float32) * s,
        "b2": jnp.zeros((1, n_embed), jnp.float32),
    }


if __name__ == "__main__":
    B, T, n_embed, n_head = 2, 8, 32, 4   # block_size = 8

    key = jax.random.PRNGKey(0)
    kx, kp = jax.random.split(key)
    x = jax.random.normal(kx, (B, T, n_embed), jnp.float32)
    params = make_params(kp, n_embed, n_head)

    out = block_forward(x, params)        # f32 matmuls (default); bf16 optional per-chip
    out = jax.block_until_ready(out)

    ref = reference_forward(x, params)
    assert out.shape == (B, T, n_embed)
    assert jnp.allclose(out, ref, atol=1e-4, rtol=1e-4), "mismatch vs reference"

    print("KERNEL_OK")
</pallas_src>

<mosaic_0001>
module attributes {stable_mosaic.version = 11 : i64} {
  func.func @block_kernel(%arg0: i32, %arg1: memref<1x8x32xf32, #tpu.memory_space<vmem>>, %arg2: memref<32x32xf32, #tpu.memory_space<vmem>>, %arg3: memref<32x32xf32, #tpu.memory_space<vmem>>, %arg4: memref<32x32xf32, #tpu.memory_space<vmem>>, %arg5: memref<32x32xf32, #tpu.memory_space<vmem>>, %arg6: memref<1x32xf32, #tpu.memory_space<vmem>>, %arg7: memref<1x32xf32, #tpu.memory_space<vmem>>, %arg8: memref<1x32xf32, #tpu.memory_space<vmem>>, %arg9: memref<1x32xf32, #tpu.memory_space<vmem>>, %arg10: memref<1x32xf32, #tpu.memory_space<vmem>>, %arg11: memref<32x128xf32, #tpu.memory_space<vmem>>, %arg12: memref<1x128xf32, #tpu.memory_space<vmem>>, %arg13: memref<128x32xf32, #tpu.memory_space<vmem>>, %arg14: memref<1x32xf32, #tpu.memory_space<vmem>>, %arg15: memref<1x8x32xf32, #tpu.memory_space<vmem>>) attributes {dimension_semantics = [#tpu.dimension_semantics<parallel>], iteration_bounds = array<i64: 2>, scalar_prefetch = 0 : i64, scratch_operands = 0 : i64, tpu.core_type = #tpu.core_type<tc>, window_params = [{transform_indices = @transform_0, window_bounds = array<i64: 1, 8, 32>}, {pipeline_mode = #tpu.pipeline_mode<synchronous>, transform_indices = @transform_1, window_bounds = array<i64: 32, 32>}, {pipeline_mode = #tpu.pipeline_mode<synchronous>, transform_indices = @transform_2, window_bounds = array<i64: 32, 32>}, {pipeline_mode = #tpu.pipeline_mode<synchronous>, transform_indices = @transform_3, window_bounds = array<i64: 32, 32>}, {pipeline_mode = #tpu.pipeline_mode<synchronous>, transform_indices = @transform_4, window_bounds = array<i64: 32, 32>}, {pipeline_mode = #tpu.pipeline_mode<synchronous>, transform_indices = @transform_5, window_bounds = array<i64: 1, 32>}, {pipeline_mode = #tpu.pipeline_mode<synchronous>, transform_indices = @transform_6, window_bounds = array<i64: 1, 32>}, {pipeline_mode = #tpu.pipeline_mode<synchronous>, transform_indices = @transform_7, window_bounds = array<i64: 1, 32>}, {pipeline_mode = #tpu.pipeline_mode<synchronous>, transform_indices = @transform_8, window_bounds = array<i64: 1, 32>}, {pipeline_mode = #tpu.pipeline_mode<synchronous>, transform_indices = @transform_9, window_bounds = array<i64: 1, 32>}, {pipeline_mode = #tpu.pipeline_mode<synchronous>, transform_indices = @transform_10, window_bounds = array<i64: 32, 128>}, {pipeline_mode = #tpu.pipeline_mode<synchronous>, transform_indices = @transform_11, window_bounds = array<i64: 1, 128>}, {pipeline_mode = #tpu.pipeline_mode<synchronous>, transform_indices = @transform_12, window_bounds = array<i64: 128, 32>}, {pipeline_mode = #tpu.pipeline_mode<synchronous>, transform_indices = @transform_13, window_bounds = array<i64: 1, 32>}, {transform_indices = @transform_14, window_bounds = array<i64: 1, 8, 32>}]} {
    %c0 = arith.constant 0 : index
    %c0_0 = arith.constant 0 : index
    %c0_1 = arith.constant 0 : index
    %0 = vector.load %arg1[%c0, %c0_0, %c0_1] : memref<1x8x32xf32, #tpu.memory_space<vmem>>, vector<1x8x32xf32>
    %1 = vector.shape_cast %0 : vector<1x8x32xf32> to vector<8x32xf32>
    %c0_2 = arith.constant 0 : index
    %c0_3 = arith.constant 0 : index
    %2 = vector.load %arg7[%c0_2, %c0_3] : memref<1x32xf32, #tpu.memory_space<vmem>>, vector<1x32xf32>
    %c0_4 = arith.constant 0 : index
    %c0_5 = arith.constant 0 : index
    %3 = vector.load %arg8[%c0_4, %c0_5] : memref<1x32xf32, #tpu.memory_space<vmem>>, vector<1x32xf32>
    %cst = arith.constant dense<0.000000e+00> : vector<8xf32>
    %4 = vector.multi_reduction <add>, %1, %cst [1] : vector<8x32xf32> to vector<8xf32>
    %5 = vector.shape_cast %4 : vector<8xf32> to vector<8x1xf32>
    %cst_6 = arith.constant 3.200000e+01 : f32
    %6 = vector.broadcast %cst_6 : f32 to vector<8x1xf32>
    %7 = arith.divf %5, %6 : vector<8x1xf32>
    %8 = vector.broadcast %7 : vector<8x1xf32> to vector<8x32xf32>
    %9 = arith.subf %1, %8 : vector<8x32xf32>
    %10 = arith.mulf %9, %9 : vector<8x32xf32>
    %cst_7 = arith.constant dense<0.000000e+00> : vector<8xf32>
    %11 = vector.multi_reduction <add>, %10, %cst_7 [1] : vector<8x32xf32> to vector<8xf32>
    %12 = vector.shape_cast %11 : vector<8xf32> to vector<8x1xf32>
    %cst_8 = arith.constant 3.200000e+01 : f32
    %13 = vector.broadcast %cst_8 : f32 to vector<8x1xf32>
    %14 = arith.divf %12, %13 : vector<8x1xf32>
    %15 = vector.broadcast %7 : vector<8x1xf32> to vector<8x32xf32>
    %16 = arith.subf %1, %15 : vector<8x32xf32>
    %cst_9 = arith.constant 9.99999974E-6 : f32
    %17 = vector.broadcast %cst_9 : f32 to vector<8x1xf32>
    %18 = arith.addf %14, %17 : vector<8x1xf32>
    %19 = math.rsqrt %18 : vector<8x1xf32>
    %20 = vector.broadcast %19 : vector<8x1xf32> to vector<8x32xf32>
    %21 = arith.mulf %16, %20 : vector<8x32xf32>
    %22 = vector.broadcast %2 : vector<1x32xf32> to vector<8x32xf32>
    %23 = arith.mulf %21, %22 : vector<8x32xf32>
    %24 = vector.broadcast %3 : vector<1x32xf32> to vector<8x32xf32>
    %25 = arith.addf %23, %24 : vector<8x32xf32>
    %c0_10 = arith.constant 0 : index
    %c0_11 = arith.constant 0 : index
    %26 = vector.load %arg2[%c0_10, %c0_11] : memref<32x32xf32, #tpu.memory_space<vmem>>, vector<32x32xf32>
    %cst_12 = arith.constant dense<0.000000e+00> : vector<8x32xf32>
    %27 = tpu.matmul %25, %26, %cst_12 {dimension_numbers = #tpu.dot_dimension_numbers<[1], [0], [0], [1], [0, 0, 1, 1], [], []>} : vector<8x32xf32>, vector<32x32xf32>, vector<8x32xf32> -> vector<8x32xf32>
    %28 = vector.shape_cast %27 : vector<8x32xf32> to vector<1x8x32xf32>
    %c0_13 = arith.constant 0 : index
    %c0_14 = arith.constant 0 : index
    %29 = vector.load %arg3[%c0_13, %c0_14] : memref<32x32xf32, #tpu.memory_space<vmem>>, vector<32x32xf32>
    %cst_15 = arith.constant dense<0.000000e+00> : vector<8x32xf32>
    %30 = tpu.matmul %25, %29, %cst_15 {dimension_numbers = #tpu.dot_dimension_numbers<[1], [0], [0], [1], [0, 0, 1, 1], [], []>} : vector<8x32xf32>, vector<32x32xf32>, vector<8x32xf32> -> vector<8x32xf32>
    %31 = vector.shape_cast %30 : vector<8x32xf32> to vector<1x8x32xf32>
    %c0_16 = arith.constant 0 : index
    %c0_17 = arith.constant 0 : index
    %32 = vector.load %arg4[%c0_16, %c0_17] : memref<32x32xf32, #tpu.memory_space<vmem>>, vector<32x32xf32>
    %cst_18 = arith.constant dense<0.000000e+00> : vector<8x32xf32>
    %33 = tpu.matmul %25, %32, %cst_18 {dimension_numbers = #tpu.dot_dimension_numbers<[1], [0], [0], [1], [0, 0, 1, 1], [], []>} : vector<8x32xf32>, vector<32x32xf32>, vector<8x32xf32> -> vector<8x32xf32>
    %34 = vector.shape_cast %33 : vector<8x32xf32> to vector<1x8x32xf32>
    %35 = tpu.iota {dimensions = array<i32: 0>} : vector<8x8xi32>
    %36 = tpu.iota {dimensions = array<i32: 1>} : vector<8x8xi32>
    %37 = arith.cmpi sle, %36, %35 : vector<8x8xi32>
    %cst_19 = arith.constant 0.000000e+00 : f32
    %cst_20 = arith.constant 0xFF800000 : f32
    %38 = vector.broadcast %cst_19 : f32 to vector<8x8xf32>
    %39 = vector.broadcast %cst_20 : f32 to vector<8x8xf32>
    %40 = arith.select %37, %38, %39 : vector<8x8xi1>, vector<8x8xf32>
    %41 = vector.shape_cast %40 : vector<8x8xf32> to vector<1x8x8xf32>
    %42 = vector.extract_strided_slice %28 {offsets = [0, 0, 0], sizes = [1, 8, 8], strides = [1, 1, 1]} : vector<1x8x32xf32> to vector<1x8x8xf32>
    %43 = vector.extract_strided_slice %31 {offsets = [0, 0, 0], sizes = [1, 8, 8], strides = [1, 1, 1]} : vector<1x8x32xf32> to vector<1x8x8xf32>
    "tpu.trace_start"() <{level = 10 : i32, message = "btd,bsd->bts"}> : () -> ()
    %cst_21 = arith.constant dense<0.000000e+00> : vector<1x8x8xf32>
    %44 = tpu.matmul %42, %43, %cst_21 {dimension_numbers = #tpu.dot_dimension_numbers<[2], [2], [1], [1], [0, 0, 0, 1, 1, 1], [0], [0]>} : vector<1x8x8xf32>, vector<1x8x8xf32>, vector<1x8x8xf32> -> vector<1x8x8xf32>
    "tpu.trace_stop"() : () -> ()
    %cst_22 = arith.constant 0.176776692 : f32
    %45 = vector.broadcast %cst_22 : f32 to vector<1x8x8xf32>
    %46 = arith.mulf %44, %45 : vector<1x8x8xf32>
    %47 = arith.addf %46, %41 : vector<1x8x8xf32>
    %cst_23 = arith.constant dense<0xFF800000> : vector<1x8xf32>
    %48 = vector.multi_reduction <maximumf>, %47, %cst_23 [2] : vector<1x8x8xf32> to vector<1x8xf32>
    %49 = vector.shape_cast %48 : vector<1x8xf32> to vector<1x8x1xf32>
    %50 = vector.broadcast %49 : vector<1x8x1xf32> to vector<1x8x8xf32>
    %51 = arith.subf %47, %50 : vector<1x8x8xf32>
    %52 = math.exp %51 : vector<1x8x8xf32>
    %cst_24 = arith.constant dense<0.000000e+00> : vector<1x8xf32>
    %53 = vector.multi_reduction <add>, %52, %cst_24 [2] : vector<1x8x8xf32> to vector<1x8xf32>
    %54 = vector.shape_cast %53 : vector<1x8xf32> to vector<1x8x1xf32>
    %55 = tpu.reciprocal %54 : vector<1x8x1xf32> -> vector<1x8x1xf32>
    %56 = vector.broadcast %55 : vector<1x8x1xf32> to vector<1x8x8xf32>
    %57 = arith.mulf %52, %56 : vector<1x8x8xf32>
    %58 = vector.extract_strided_slice %34 {offsets = [0, 0, 0], sizes = [1, 8, 8], strides = [1, 1, 1]} : vector<1x8x32xf32> to vector<1x8x8xf32>
    "tpu.trace_start"() <{level = 10 : i32, message = "bts,bsd->btd"}> : () -> ()
    %cst_25 = arith.constant dense<0.000000e+00> : vector<1x8x8xf32>
    %59 = tpu.matmul %57, %58, %cst_25 {dimension_numbers = #tpu.dot_dimension_numbers<[2], [1], [1], [2], [0, 0, 0, 1, 1, 2], [0], [0]>} : vector<1x8x8xf32>, vector<1x8x8xf32>, vector<1x8x8xf32> -> vector<1x8x8xf32>
    "tpu.trace_stop"() : () -> ()
    %60 = vector.shape_cast %59 : vector<1x8x8xf32> to vector<8x8xf32>
    %c0_26 = arith.constant 0 : index
    %c0_27 = arith.constant 0 : index
    %61 = vector.load %arg5[%c0_26, %c0_27] : memref<32x32xf32, #tpu.memory_space<vmem>>, vector<8x32xf32>
    %cst_28 = arith.constant dense<0.000000e+00> : vector<8x32xf32>
    %62 = tpu.matmul %60, %61, %cst_28 {dimension_numbers = #tpu.dot_dimension_numbers<[1], [0], [0], [1], [0, 0, 1, 1], [], []>} : vector<8x8xf32>, vector<8x32xf32>, vector<8x32xf32> -> vector<8x32xf32>
    %63 = vector.extract_strided_slice %28 {offsets = [0, 0, 8], sizes = [1, 8, 8], strides = [1, 1, 1]} : vector<1x8x32xf32> to vector<1x8x8xf32>
    %64 = vector.extract_strided_slice %31 {offsets = [0, 0, 8], sizes = [1, 8, 8], strides = [1, 1, 1]} : vector<1x8x32xf32> to vector<1x8x8xf32>
    "tpu.trace_start"() <{level = 10 : i32, message = "btd,bsd->bts"}> : () -> ()
    %cst_29 = arith.constant dense<0.000000e+00> : vector<1x8x8xf32>
    %65 = tpu.matmul %63, %64, %cst_29 {dimension_numbers = #tpu.dot_dimension_numbers<[2], [2], [1], [1], [0, 0, 0, 1, 1, 1], [0], [0]>} : vector<1x8x8xf32>, vector<1x8x8xf32>, vector<1x8x8xf32> -> vector<1x8x8xf32>
    "tpu.trace_stop"() : () -> ()
    %cst_30 = arith.constant 0.176776692 : f32
    %66 = vector.broadcast %cst_30 : f32 to vector<1x8x8xf32>
    %67 = arith.mulf %65, %66 : vector<1x8x8xf32>
    %68 = arith.addf %67, %41 : vector<1x8x8xf32>
    %cst_31 = arith.constant dense<0xFF800000> : vector<1x8xf32>
    %69 = vector.multi_reduction <maximumf>, %68, %cst_31 [2] : vector<1x8x8xf32> to vector<1x8xf32>
    %70 = vector.shape_cast %69 : vector<1x8xf32> to vector<1x8x1xf32>
    %71 = vector.broadcast %70 : vector<1x8x1xf32> to vector<1x8x8xf32>
    %72 = arith.subf %68, %71 : vector<1x8x8xf32>
    %73 = math.exp %72 : vector<1x8x8xf32>
    %cst_32 = arith.constant dense<0.000000e+00> : vector<1x8xf32>
    %74 = vector.multi_reduction <add>, %73, %cst_32 [2] : vector<1x8x8xf32> to vector<1x8xf32>
    %75 = vector.shape_cast %74 : vector<1x8xf32> to vector<1x8x1xf32>
    %76 = tpu.reciprocal %75 : vector<1x8x1xf32> -> vector<1x8x1xf32>
    %77 = vector.broadcast %76 : vector<1x8x1xf32> to vector<1x8x8xf32>
    %78 = arith.mulf %73, %77 : vector<1x8x8xf32>
    %79 = vector.extract_strided_slice %34 {offsets = [0, 0, 8], sizes = [1, 8, 8], strides = [1, 1, 1]} : vector<1x8x32xf32> to vector<1x8x8xf32>
    "tpu.trace_start"() <{level = 10 : i32, message = "bts,bsd->btd"}> : () -> ()
    %cst_33 = arith.constant dense<0.000000e+00> : vector<1x8x8xf32>
    %80 = tpu.matmul %78, %79, %cst_33 {dimension_numbers = #tpu.dot_dimension_numbers<[2], [1], [1], [2], [0, 0, 0, 1, 1, 2], [0], [0]>} : vector<1x8x8xf32>, vector<1x8x8xf32>, vector<1x8x8xf32> -> vector<1x8x8xf32>
    "tpu.trace_stop"() : () -> ()
    %81 = vector.shape_cast %80 : vector<1x8x8xf32> to vector<8x8xf32>
    %c8 = arith.constant 8 : index
    %c0_34 = arith.constant 0 : index
    %82 = vector.load %arg5[%c8, %c0_34] : memref<32x32xf32, #tpu.memory_space<vmem>>, vector<8x32xf32>
    %cst_35 = arith.constant dense<0.000000e+00> : vector<8x32xf32>
    %83 = tpu.matmul %81, %82, %cst_35 {dimension_numbers = #tpu.dot_dimension_numbers<[1], [0], [0], [1], [0, 0, 1, 1], [], []>} : vector<8x8xf32>, vector<8x32xf32>, vector<8x32xf32> -> vector<8x32xf32>
    %84 = arith.addf %62, %83 : vector<8x32xf32>
    %85 = vector.extract_strided_slice %28 {offsets = [0, 0, 16], sizes = [1, 8, 8], strides = [1, 1, 1]} : vector<1x8x32xf32> to vector<1x8x8xf32>
    %86 = vector.extract_strided_slice %31 {offsets = [0, 0, 16], sizes = [1, 8, 8], strides = [1, 1, 1]} : vector<1x8x32xf32> to vector<1x8x8xf32>
    "tpu.trace_start"() <{level = 10 : i32, message = "btd,bsd->bts"}> : () -> ()
    %cst_36 = arith.constant dense<0.000000e+00> : vector<1x8x8xf32>
    %87 = tpu.matmul %85, %86, %cst_36 {dimension_numbers = #tpu.dot_dimension_numbers<[2], [2], [1], [1], [0, 0, 0, 1, 1, 1], [0], [0]>} : vector<1x8x8xf32>, vector<1x8x8xf32>, vector<1x8x8xf32> -> vector<1x8x8xf32>
    "tpu.trace_stop"() : () -> ()
    %cst_37 = arith.constant 0.176776692 : f32
    %88 = vector.broadcast %cst_37 : f32 to vector<1x8x8xf32>
    %89 = arith.mulf %87, %88 : vector<1x8x8xf32>
    %90 = arith.addf %89, %41 : vector<1x8x8xf32>
    %cst_38 = arith.constant dense<0xFF800000> : vector<1x8xf32>
    %91 = vector.multi_reduction <maximumf>, %90, %cst_38 [2] : vector<1x8x8xf32> to vector<1x8xf32>
    %92 = vector.shape_cast %91 : vector<1x8xf32> to vector<1x8x1xf32>
    %93 = vector.broadcast %92 : vector<1x8x1xf32> to vector<1x8x8xf32>
    %94 = arith.subf %90, %93 : vector<1x8x8xf32>
    %95 = math.exp %94 : vector<1x8x8xf32>
    %cst_39 = arith.constant dense<0.000000e+00> : vector<1x8xf32>
    %96 = vector.multi_reduction <add>, %95, %cst_39 [2] : vector<1x8x8xf32> to vector<1x8xf32>
    %97 = vector.shape_cast %96 : vector<1x8xf32> to vector<1x8x1xf32>
    %98 = tpu.reciprocal %97 : vector<1x8x1xf32> -> vector<1x8x1xf32>
    %99 = vector.broadcast %98 : vector<1x8x1xf32> to vector<1x8x8xf32>
    %100 = arith.mulf %95, %99 : vector<1x8x8xf32>
    %101 = vector.extract_strided_slice %34 {offsets = [0, 0, 16], sizes = [1, 8, 8], strides = [1, 1, 1]} : vector<1x8x32xf32> to vector<1x8x8xf32>
    "tpu.trace_start"() <{level = 10 : i32, message = "bts,bsd->btd"}> : () -> ()
    %cst_40 = arith.constant dense<0.000000e+00> : vector<1x8x8xf32>
    %102 = tpu.matmul %100, %101, %cst_40 {dimension_numbers = #tpu.dot_dimension_numbers<[2], [1], [1], [2], [0, 0, 0, 1, 1, 2], [0], [0]>} : vector<1x8x8xf32>, vector<1x8x8xf32>, vector<1x8x8xf32> -> vector<1x8x8xf32>
    "tpu.trace_stop"() : () -> ()
    %103 = vector.shape_cast %102 : vector<1x8x8xf32> to vector<8x8xf32>
    %c16 = arith.constant 16 : index
    %c0_41 = arith.constant 0 : index
    %104 = vector.load %arg5[%c16, %c0_41] : memref<32x32xf32, #tpu.memory_space<vmem>>, vector<8x32xf32>
    %cst_42 = arith.constant dense<0.000000e+00> : vector<8x32xf32>
    %105 = tpu.matmul %103, %104, %cst_42 {dimension_numbers = #tpu.dot_dimension_numbers<[1], [0], [0], [1], [0, 0, 1, 1], [], []>} : vector<8x8xf32>, vector<8x32xf32>, vector<8x32xf32> -> vector<8x32xf32>
    %106 = arith.addf %84, %105 : vector<8x32xf32>
    %107 = vector.extract_strided_slice %28 {offsets = [0, 0, 24], sizes = [1, 8, 8], strides = [1, 1, 1]} : vector<1x8x32xf32> to vector<1x8x8xf32>
    %108 = vector.extract_strided_slice %31 {offsets = [0, 0, 24], sizes = [1, 8, 8], strides = [1, 1, 1]} : vector<1x8x32xf32> to vector<1x8x8xf32>
    "tpu.trace_start"() <{level = 10 : i32, message = "btd,bsd->bts"}> : () -> ()
    %cst_43 = arith.constant dense<0.000000e+00> : vector<1x8x8xf32>
    %109 = tpu.matmul %107, %108, %cst_43 {dimension_numbers = #tpu.dot_dimension_numbers<[2], [2], [1], [1], [0, 0, 0, 1, 1, 1], [0], [0]>} : vector<1x8x8xf32>, vector<1x8x8xf32>, vector<1x8x8xf32> -> vector<1x8x8xf32>
    "tpu.trace_stop"() : () -> ()
    %cst_44 = arith.constant 0.176776692 : f32
    %110 = vector.broadcast %cst_44 : f32 to vector<1x8x8xf32>
    %111 = arith.mulf %109, %110 : vector<1x8x8xf32>
    %112 = arith.addf %111, %41 : vector<1x8x8xf32>
    %cst_45 = arith.constant dense<0xFF800000> : vector<1x8xf32>
    %113 = vector.multi_reduction <maximumf>, %112, %cst_45 [2] : vector<1x8x8xf32> to vector<1x8xf32>
    %114 = vector.shape_cast %113 : vector<1x8xf32> to vector<1x8x1xf32>
    %115 = vector.broadcast %114 : vector<1x8x1xf32> to vector<1x8x8xf32>
    %116 = arith.subf %112, %115 : vector<1x8x8xf32>
    %117 = math.exp %116 : vector<1x8x8xf32>
    %cst_46 = arith.constant dense<0.000000e+00> : vector<1x8xf32>
    %118 = vector.multi_reduction <add>, %117, %cst_46 [2] : vector<1x8x8xf32> to vector<1x8xf32>
    %119 = vector.shape_cast %118 : vector<1x8xf32> to vector<1x8x1xf32>
    %120 = tpu.reciprocal %119 : vector<1x8x1xf32> -> vector<1x8x1xf32>
    %121 = vector.broadcast %120 : vector<1x8x1xf32> to vector<1x8x8xf32>
    %122 = arith.mulf %117, %121 : vector<1x8x8xf32>
    %123 = vector.extract_strided_slice %34 {offsets = [0, 0, 24], sizes = [1, 8, 8], strides = [1, 1, 1]} : vector<1x8x32xf32> to vector<1x8x8xf32>
    "tpu.trace_start"() <{level = 10 : i32, message = "bts,bsd->btd"}> : () -> ()
    %cst_47 = arith.constant dense<0.000000e+00> : vector<1x8x8xf32>
    %124 = tpu.matmul %122, %123, %cst_47 {dimension_numbers = #tpu.dot_dimension_numbers<[2], [1], [1], [2], [0, 0, 0, 1, 1, 2], [0], [0]>} : vector<1x8x8xf32>, vector<1x8x8xf32>, vector<1x8x8xf32> -> vector<1x8x8xf32>
    "tpu.trace_stop"() : () -> ()
    %125 = vector.shape_cast %124 : vector<1x8x8xf32> to vector<8x8xf32>
    %c24 = arith.constant 24 : index
    %c0_48 = arith.constant 0 : index
    %126 = vector.load %arg5[%c24, %c0_48] : memref<32x32xf32, #tpu.memory_space<vmem>>, vector<8x32xf32>
    %cst_49 = arith.constant dense<0.000000e+00> : vector<8x32xf32>
    %127 = tpu.matmul %125, %126, %cst_49 {dimension_numbers = #tpu.dot_dimension_numbers<[1], [0], [0], [1], [0, 0, 1, 1], [], []>} : vector<8x8xf32>, vector<8x32xf32>, vector<8x32xf32> -> vector<8x32xf32>
    %128 = arith.addf %106, %127 : vector<8x32xf32>
    %c0_50 = arith.constant 0 : index
    %c0_51 = arith.constant 0 : index
    %129 = vector.load %arg6[%c0_50, %c0_51] : memref<1x32xf32, #tpu.memory_space<vmem>>, vector<1x32xf32>
    %130 = vector.broadcast %129 : vector<1x32xf32> to vector<8x32xf32>
    %131 = arith.addf %128, %130 : vector<8x32xf32>
    %132 = arith.addf %1, %131 : vector<8x32xf32>
    %c0_52 = arith.constant 0 : index
    %c0_53 = arith.constant 0 : index
    %133 = vector.load %arg9[%c0_52, %c0_53] : memref<1x32xf32, #tpu.memory_space<vmem>>, vector<1x32xf32>
    %c0_54 = arith.constant 0 : index
    %c0_55 = arith.constant 0 : index
    %134 = vector.load %arg10[%c0_54, %c0_55] : memref<1x32xf32, #tpu.memory_space<vmem>>, vector<1x32xf32>
    %cst_56 = arith.constant dense<0.000000e+00> : vector<8xf32>
    %135 = vector.multi_reduction <add>, %132, %cst_56 [1] : vector<8x32xf32> to vector<8xf32>
    %136 = vector.shape_cast %135 : vector<8xf32> to vector<8x1xf32>
    %cst_57 = arith.constant 3.200000e+01 : f32
    %137 = vector.broadcast %cst_57 : f32 to vector<8x1xf32>
    %138 = arith.divf %136, %137 : vector<8x1xf32>
    %139 = vector.broadcast %138 : vector<8x1xf32> to vector<8x32xf32>
    %140 = arith.subf %132, %139 : vector<8x32xf32>
    %141 = arith.mulf %140, %140 : vector<8x32xf32>
    %cst_58 = arith.constant dense<0.000000e+00> : vector<8xf32>
    %142 = vector.multi_reduction <add>, %141, %cst_58 [1] : vector<8x32xf32> to vector<8xf32>
    %143 = vector.shape_cast %142 : vector<8xf32> to vector<8x1xf32>
    %cst_59 = arith.constant 3.200000e+01 : f32
    %144 = vector.broadcast %cst_59 : f32 to vector<8x1xf32>
    %145 = arith.divf %143, %144 : vector<8x1xf32>
    %146 = vector.broadcast %138 : vector<8x1xf32> to vector<8x32xf32>
    %147 = arith.subf %132, %146 : vector<8x32xf32>
    %cst_60 = arith.constant 9.99999974E-6 : f32
    %148 = vector.broadcast %cst_60 : f32 to vector<8x1xf32>
    %149 = arith.addf %145, %148 : vector<8x1xf32>
    %150 = math.rsqrt %149 : vector<8x1xf32>
    %151 = vector.broadcast %150 : vector<8x1xf32> to vector<8x32xf32>
    %152 = arith.mulf %147, %151 : vector<8x32xf32>
    %153 = vector.broadcast %133 : vector<1x32xf32> to vector<8x32xf32>
    %154 = arith.mulf %152, %153 : vector<8x32xf32>
    %155 = vector.broadcast %134 : vector<1x32xf32> to vector<8x32xf32>
    %156 = arith.addf %154, %155 : vector<8x32xf32>
    %c0_61 = arith.constant 0 : index
    %c0_62 = arith.constant 0 : index
    %157 = vector.load %arg11[%c0_61, %c0_62] : memref<32x128xf32, #tpu.memory_space<vmem>>, vector<32x128xf32>
    %cst_63 = arith.constant dense<0.000000e+00> : vector<8x128xf32>
    %158 = tpu.matmul %156, %157, %cst_63 {dimension_numbers = #tpu.dot_dimension_numbers<[1], [0], [0], [1], [0, 0, 1, 1], [], []>} : vector<8x32xf32>, vector<32x128xf32>, vector<8x128xf32> -> vector<8x128xf32>
    %c0_64 = arith.constant 0 : index
    %c0_65 = arith.constant 0 : index
    %159 = vector.load %arg12[%c0_64, %c0_65] : memref<1x128xf32, #tpu.memory_space<vmem>>, vector<1x128xf32>
    %160 = vector.broadcast %159 : vector<1x128xf32> to vector<8x128xf32>
    %161 = arith.addf %158, %160 : vector<8x128xf32>
    %cst_66 = arith.constant 0.000000e+00 : f32
    %162 = vector.broadcast %cst_66 : f32 to vector<8x128xf32>
    %163 = arith.maximumf %161, %162 : vector<8x128xf32>
    %c0_67 = arith.constant 0 : index
    %c0_68 = arith.constant 0 : index
    %164 = vector.load %arg13[%c0_67, %c0_68] : memref<128x32xf32, #tpu.memory_space<vmem>>, vector<128x32xf32>
    %cst_69 = arith.constant dense<0.000000e+00> : vector<8x32xf32>
    %165 = tpu.matmul %163, %164, %cst_69 {dimension_numbers = #tpu.dot_dimension_numbers<[1], [0], [0], [1], [0, 0, 1, 1], [], []>} : vector<8x128xf32>, vector<128x32xf32>, vector<8x32xf32> -> vector<8x32xf32>
    %c0_70 = arith.constant 0 : index
    %c0_71 = arith.constant 0 : index
    %166 = vector.load %arg14[%c0_70, %c0_71] : memref<1x32xf32, #tpu.memory_space<vmem>>, vector<1x32xf32>
    %167 = vector.broadcast %166 : vector<1x32xf32> to vector<8x32xf32>
    %168 = arith.addf %165, %167 : vector<8x32xf32>
    %169 = arith.addf %132, %168 : vector<8x32xf32>
    %170 = vector.shape_cast %169 : vector<8x32xf32> to vector<1x8x32xf32>
    %c0_72 = arith.constant 0 : index
    %c0_73 = arith.constant 0 : index
    %c0_74 = arith.constant 0 : index
    %171 = vector.load %arg15[%c0_72, %c0_73, %c0_74] : memref<1x8x32xf32, #tpu.memory_space<vmem>>, vector<1x8x32xf32>
    tpu.vector_store %arg15[%c0_72, %c0_73, %c0_74], %170 {strides = array<i32>} : memref<1x8x32xf32, #tpu.memory_space<vmem>>, vector<1x8x32xf32>,
    return
  }
  func.func @transform_0(%arg0: i32) -> (i32, i32, i32) {
    %c0_i32 = arith.constant 0 : i32
    %c0_i32_0 = arith.constant 0 : i32
    %c0_i32_1 = arith.constant 0 : i32
    return %arg0, %c0_i32, %c0_i32_0 : i32, i32, i32
  }
  func.func @transform_1(%arg0: i32) -> (i32, i32) {
    %c0_i32 = arith.constant 0 : i32
    %c0_i32_0 = arith.constant 0 : i32
    %c0_i32_1 = arith.constant 0 : i32
    return %c0_i32, %c0_i32_0 : i32, i32
  }
  func.func @transform_2(%arg0: i32) -> (i32, i32) {
    %c0_i32 = arith.constant 0 : i32
    %c0_i32_0 = arith.constant 0 : i32
    %c0_i32_1 = arith.constant 0 : i32
    return %c0_i32, %c0_i32_0 : i32, i32
  }
  func.func @transform_3(%arg0: i32) -> (i32, i32) {
    %c0_i32 = arith.constant 0 : i32
    %c0_i32_0 = arith.constant 0 : i32
    %c0_i32_1 = arith.constant 0 : i32
    return %c0_i32, %c0_i32_0 : i32, i32
  }
  func.func @transform_4(%arg0: i32) -> (i32, i32) {
    %c0_i32 = arith.constant 0 : i32
    %c0_i32_0 = arith.constant 0 : i32
    %c0_i32_1 = arith.constant 0 : i32
    return %c0_i32, %c0_i32_0 : i32, i32
  }
  func.func @transform_5(%arg0: i32) -> (i32, i32) {
    %c0_i32 = arith.constant 0 : i32
    %c0_i32_0 = arith.constant 0 : i32
    %c0_i32_1 = arith.constant 0 : i32
    return %c0_i32, %c0_i32_0 : i32, i32
  }
  func.func @transform_6(%arg0: i32) -> (i32, i32) {
    %c0_i32 = arith.constant 0 : i32
    %c0_i32_0 = arith.constant 0 : i32
    %c0_i32_1 = arith.constant 0 : i32
    return %c0_i32, %c0_i32_0 : i32, i32
  }
  func.func @transform_7(%arg0: i32) -> (i32, i32) {
    %c0_i32 = arith.constant 0 : i32
    %c0_i32_0 = arith.constant 0 : i32
    %c0_i32_1 = arith.constant 0 : i32
    return %c0_i32, %c0_i32_0 : i32, i32
  }
  func.func @transform_8(%arg0: i32) -> (i32, i32) {
    %c0_i32 = arith.constant 0 : i32
    %c0_i32_0 = arith.constant 0 : i32
    %c0_i32_1 = arith.constant 0 : i32
    return %c0_i32, %c0_i32_0 : i32, i32
  }
  func.func @transform_9(%arg0: i32) -> (i32, i32) {
    %c0_i32 = arith.constant 0 : i32
    %c0_i32_0 = arith.constant 0 : i32
    %c0_i32_1 = arith.constant 0 : i32
    return %c0_i32, %c0_i32_0 : i32, i32
  }
  func.func @transform_10(%arg0: i32) -> (i32, i32) {
    %c0_i32 = arith.constant 0 : i32
    %c0_i32_0 = arith.constant 0 : i32
    %c0_i32_1 = arith.constant 0 : i32
    return %c0_i32, %c0_i32_0 : i32, i32
  }
  func.func @transform_11(%arg0: i32) -> (i32, i32) {
    %c0_i32 = arith.constant 0 : i32
    %c0_i32_0 = arith.constant 0 : i32
    %c0_i32_1 = arith.constant 0 : i32
    return %c0_i32, %c0_i32_0 : i32, i32
  }
  func.func @transform_12(%arg0: i32) -> (i32, i32) {
    %c0_i32 = arith.constant 0 : i32
    %c0_i32_0 = arith.constant 0 : i32
    %c0_i32_1 = arith.constant 0 : i32
    return %c0_i32, %c0_i32_0 : i32, i32
  }
  func.func @transform_13(%arg0: i32) -> (i32, i32) {
    %c0_i32 = arith.constant 0 : i32
    %c0_i32_0 = arith.constant 0 : i32
    %c0_i32_1 = arith.constant 0 : i32
    return %c0_i32, %c0_i32_0 : i32, i32
  }
  func.func @transform_14(%arg0: i32) -> (i32, i32, i32) {
    %c0_i32 = arith.constant 0 : i32
    %c0_i32_0 = arith.constant 0 : i32
    %c0_i32_1 = arith.constant 0 : i32
    return %arg0, %c0_i32, %c0_i32_0 : i32, i32, i32
  }
}

</mosaic_0001>

<bundles_post_ra>
// kernel: block_forward.1
= control target key start
LH: loop header
LB: loop body
LE: loop exit
PB: predicated region body
PF: predicated region fallthrough
CT: control target
= control target key end

     0   :  { %s1724_s0 = inlined_call_operand.vmem [shape: f32[2,8,32], index: 0, kind: input, shape index: {}]   ;;  %s1725_s1 = inlined_call_operand.vmem [shape: f32[32,32], index: 1, kind: input, shape index: {}]   ;;  %s1726_s2 = inlined_call_operand.vmem [shape: f32[32,32], index: 2, kind: input, shape index: {}]   ;;  %s1727_s3 = inlined_call_operand.vmem [shape: f32[32,32], index: 3, kind: input, shape index: {}]   ;;  %s1728_s4 = inlined_call_operand.vmem [shape: f32[32,32], index: 4, kind: input, shape index: {}]   ;;  %s1729_s5 = inlined_call_operand.vmem [shape: f32[1,32], index: 5, kind: input, shape index: {}]   ;;  %s1730_s6 = inlined_call_operand.vmem [shape: f32[1,32], index: 6, kind: input, shape index: {}]   ;;  %s1731_s7 = inlined_call_operand.vmem [shape: f32[1,32], index: 7, kind: input, shape index: {}]   ;;  %s1732_s8 = inlined_call_operand.vmem [shape: f32[1,32], index: 8, kind: input, shape index: {}]   ;;  %s1733_s9 = inlined_call_operand.vmem [shape: f32[1,32], index: 9, kind: input, shape index: {}]   ;;  %s1734_s10 = inlined_call_operand.vmem [shape: f32[32,128], index: 10, kind: input, shape index: {}]   ;;  %s1735_s11 = inlined_call_operand.vmem [shape: f32[1,128], index: 11, kind: input, shape index: {}]   ;;  %s1736_s12 = inlined_call_operand.vmem [shape: f32[128,32], index: 12, kind: input, shape index: {}]   ;;  %s1737_s13 = inlined_call_operand.vmem [shape: f32[1,32], index: 13, kind: input, shape index: {}]   ;;  %s1738_s14 = inlined_call_operand.hbm [shape: f32[2,8,32], index: 14, kind: output, shape index: {}]  }
   0x1   :  { %1740 = sst [smem:[#allocation7_spill]] %s1724_s0 }
   0x2   :  { %1741 = sst [smem:[#allocation8_spill]] %s1725_s1 }
   0x3   :  { %1742 = sst [smem:[#allocation9_spill]] %s1726_s2 }
   0x4   :  { %19 = vsyncpa [#allocation3], 0 }
   0x5   :  { %21 = vsyncpa [#allocation3 + $0x1], 0  ;;  %s1434_s29 = smov 0   ;;  %s1436_s30 = smov 0  }
   0x6   :  { %s1438_s15 = smov 0   ;;  %s1440_s16 = smov 0  }
   0x7 LB: > { %1743 = sst [smem:[#allocation5_spill]] %s1348_s15  ;;  %s1455_s17 = sadd.s32 4294967295, %s1352_s16   ;;  %s1352_s16 = sphi %s1440_s16, %s1754_s16   ;;  %s1348_s15 = sphi %s1438_s15, %s1751_s15   ;;  %s1344_s30 = sphi %s1436_s30, %s1753_s30   ;;  %s1340_s29 = sphi %s1434_s29, %s1752_s29  }
   0x8   : > { %s1187_s18 = sadd.s32 4294967294, %s1352_s16   ;;  %s1459_s19 = sadd.s32 1, %s1352_s16  }
   0x9   : > { %s333_s20 = sadd.s32 1, %s1348_s15  ;;  %s330_s21 = ssub.s32 %s1352_s16, %s1459_s19 }
   0xa   : > { %p343_p0 = scmp.ne.s32.totalorder %s1348_s15, %s1344_s30  ;;  %p331_p1 = scmp.eq.s32.totalorder %s330_s21, 0 }
   0xb   : > { %p344_p2 = scmp.eq.s32.totalorder %s1455_s17, 1  ;;  %p349_p3 = scmp.ne.s32.totalorder %s1344_s30, %s1340_s29 }
   0xc   : > { %p350_p4 = scmp.eq.s32.totalorder %s1187_s18, 1  ;;  %p1190_p7 = scmp.ge.s32.totalorder %s1352_s16, 1 }
   0xd   : > { %s1470_s22 = scalar_select %p331_p1, %s1348_s15, %s333_s20  }
   0xe   : > { %p1472_p5 = por %p344_p2, %p343_p0  ;;  %p1476_p6 = por %p350_p4, %p349_p3 }
   0xf   : > { %1744 = sst [smem:[#allocation6_spill]] %s1470_s22  ;;  %p414_p8 = scmp.lt.s32.totalorder %s1352_s16, 3 }
  0x11   : > { %p415_p9 = pnand %p1190_p7, %p414_p8 }
  0x12   : > { %p459_p10 = scmp.lt.s32.totalorder (!%p415_p9), %s1455_s17, 1  ;;  %s1747_s0 = sld [smem:[#allocation7_spill]] (!%p415_p9) }
  0x13   : > { %418 = sbr.rel (%p415_p9) target bundleno = 1771 (0x6eb), region = 76  ;;  %s1748_s1 = sld [smem:[#allocation8_spill]] (!%p415_p9) }
  0x14   : > { %s1749_s2 = sld [smem:[#allocation9_spill]] (!%p415_p9)  ;;  %s1355_s15 = smov (!%p415_p9), 112  }
  0x15   : > { %s1356_s22 = smov (!%p415_p9), 120   ;;  %s1357_s20 = smov (!%p415_p9), 104  }
  0x18   : > { %s460_s25 = scalar_select %p459_p10, %s1455_s17, 1  ;;  %vm466_vm0 = vcmask 261120   ;;  %v1354_v2 = vmov 32.0   ;;  %v558_v16 = vld [vmem:[%s1727_s3 + $0x18] sm:$0xff]  ;;  %v557_v19 = vld [vmem:[%s1727_s3 + $0x10] sm:$0xff]  ;;  %v556_v22 = vld [vmem:[%s1727_s3 + $0x8] sm:$0xff]  ;;  %v579_v47 = vlaneseq }
  0x19   : > { %1268 = vrcp.f32 %v1354_v2  ;;  %v507_v14 = vld [vmem:[%s1748_s1 + $0x18] sm:$0xff]  ;;  %v506_v17 = vld [vmem:[%s1748_s1 + $0x10] sm:$0xff]  ;;  %571 = vmatpush.msra.mxu2 %v558_v16  ;;  %v505_v20 = vld [vmem:[%s1748_s1 + $0x8] sm:$0xff]  ;;  %vm585_vm5 = vcmask 64512   ;;  %v1358_v52 = vmov -inf  }
  0x1a   : > { %s1192_s26 = sshll.u32 %s460_s25, 3  ;;  %v534_v15 = vld [vmem:[%s1749_s2 + $0x18] sm:$0xff]  ;;  %523 = vmatpush.msra.mxu0 %v507_v14  ;;  %v533_v18 = vld [vmem:[%s1749_s2 + $0x10] sm:$0xff]  ;;  %v532_v21 = vld [vmem:[%s1749_s2 + $0x8] sm:$0xff]  ;;  %v580_v49 = vshrl.u32 %v579_v47, 7  ;;  %v582_v50 = vand.u32 127, %v579_v47 }
  0x1b   : > { %s462_s18 = scalar_lea.vmem %s1747_s0, %s1192_s26  ;;  %547 = vmatpush.msra.mxu1 %v534_v15  ;;  %572 = vmatpush.msra.mxu2 %v557_v19  ;;  %v504_v23 = vld [vmem:[%s1748_s1] sm:$0xff] }
  0x1c   : > { %v1487_v0 = vld [vmem:[%s462_s18] sm:$0xff]  ;;  %524 = vmatpush.msra.mxu0 %v506_v17  ;;  %vm583_vm6 = vcmp.le.s32.totalorder %v582_v50, %v580_v49  ;;  %s456_s18 = sand.u32 1, %s1344_s30  }
  0x1d   : > { %v467_v1 = vsel %vm466_vm0, %v1487_v0, 0.0  ;;  %548 = vmatpush.msra.mxu1 %v533_v18  ;;  %v531_v24 = vld [vmem:[%s1749_s2] sm:$0xff]  ;;  %573 = vmatpush.msra.mxu2 %v556_v22  ;;  %v584_v53 = vsel %vm583_vm6, 0.0, %v1358_v52 }
  0x1e   : > { %468 = vadd.xlane.f32.xlu0 %v467_v1  ;;  %525 = vmatpush.msra.mxu0 %v505_v20  ;;  %v555_v25 = vld [vmem:[%s1727_s3] sm:$0xff] }
  0x1f   : > { %v1269_v3 = vpop.eup %1268  ;;  %549 = vmatpush.msra.mxu1 %v532_v21  ;;  %574 = vmatpush.msra.mxu2 %v555_v25  ;;  %v1261_v35 = vld [vmem:[%s1730_s6] ss:$0 sm:$0xff] }
  0x20   : > { %v471_v4 = vmul.f32 32.0, %v1269_v3  ;;  %vm475_vm1 = vweird.f32 %v1269_v3  ;;  %526 = vmatpush.msra.mxu0 %v504_v23  ;;  %v1262_v38 = vld [vmem:[%s1731_s7] ss:$0 sm:$0xff] }
  0x21   : > { %550 = vmatpush.msra.mxu1 %v531_v24 }
  0x22   : > { %v472_v5 = vsub.f32 1.0, %v471_v4 }
  0x24   : > { %v473_v6 = vmul.f32 %v1269_v3, %v472_v5 }
  0x26   : > { %v474_v7 = vadd.f32 %v1269_v3, %v473_v6 }
  0x28   : > { %v1491_v8 = vsel %vm475_vm1, %v1269_v3, %v474_v7 }
  0x91   : > { %v469_v9 = vpop.xlane.xlu0 %468 }
  0x92   : > { %v477_v10 = vmul.f32 %v1491_v8, %v469_v9 }
  0x94   : > { %v478_v11 = vsub.f32 %v1487_v0, %v477_v10 }
  0x96   : > { %v479_v12 = vmul.f32 %v478_v11, %v478_v11 }
  0x98   : > { %v480_v13 = vsel %vm466_vm0, %v479_v12, 0.0 }
  0x99   : > { %481 = vadd.xlane.f32.xlu0 %v480_v13 }
 0x10c   : > { %v482_v26 = vpop.xlane.xlu0 %481 }
 0x10d   : > { %v483_v27 = vmul.f32 %v482_v26, %v1491_v8 }
 0x10f   : > { %v484_v28 = vadd.f32 1e-05, %v483_v27 }
 0x111   : > { %1270 = vrsqrt.f32 %v484_v28  ;;  %vm491_vm3 = vweird.f32 %v484_v28 }
 0x117   : > { %v1271_v29 = vpop.eup %1270 }
 0x118   : > { %v486_v30 = vmul.f32 %v1271_v29, %v484_v28  ;;  %vm492_vm2 = vweird.f32 %v1271_v29 }
 0x119   : > { %vm493_vm4 = vmor %vm491_vm3, %vm492_vm2 }
 0x11a   : > { %v487_v31 = vmul.f32 %v1271_v29, %v486_v30 }
 0x11c   : > { %v488_v32 = vmul.f32 0.5, %v487_v31 }
 0x11e   : > { %v489_v33 = vsub.f32 1.5, %v488_v32 }
 0x120   : > { %v490_v34 = vmul.f32 %v1271_v29, %v489_v33 }
 0x122   : > { %v494_v36 = vsel %vm493_vm4, %v1271_v29, %v490_v34 }
 0x123   : > { %v495_v37 = vmul.f32 %v494_v36, %v478_v11 }
 0x125   : > { %v499_v39 = vmul.f32 %v1261_v35, %v495_v37 }
 0x127   : > { %v503_v40 = vadd.f32 %v1262_v38, %v499_v39 }
 0x129   : > { %1193 = vmatmul.msk.f32.vlgmr.msra.gmra.mxu0 %vm466_vm0, %v503_v40  ;;  %1194 = vmatmul.msk.f32.vlgmr.msra.gmra.mxu1 %vm466_vm0, %v503_v40 }
 0x12a   : > { %1195 = vmatmul.msk.f32.vlgmr.msra.gmra.mxu2 %vm466_vm0, %v503_v40 }
 0x1a6   : > { %v528_v41 = vpop.f32.mrf.mxu0  ;;  %v552_v42 = vpop.f32.mrf.mxu1 }
 0x1a7   : > { %792 = vrot.lane.b32.xlu2 %v552_v42, %s1355_s15  ;;  %664 = vrot.lane.b32.xlu1 %v552_v42, %s1356_s22 }
 0x1a8   : > { %1196 = vmatpush.xpose.msk.msrb.mxu0 %vm585_vm5, %v552_v42  ;;  %790 = vrot.lane.b32.xlu0 %v528_v41, %s1355_s15 }
 0x1ab   : > { %1197 = vmatmul.msk.f32.vlgmr.msrb.gmra.mxu0 %vm585_vm5, %v528_v41 }
 0x1ad   : > { %v1547_v43 = vpop.f32.mrf.mxu2 }
 0x1ae   : > { %656 = vmatpush.msrb.mxu1 %v1547_v43 }
 0x1af   : > { %897 = vrot.lane.b32.xlu2 %v552_v42, %s1357_s20  ;;  %662 = vrot.lane.b32.xlu1 %v528_v41, %s1356_s22 }
 0x1b7   : > { %895 = vrot.lane.b32.xlu1 %v528_v41, %s1357_s20 }
 0x201   : > { %v793_v44 = vpop.permute.xlu2 %792 }
 0x209   : > { %v898_v45 = vpop.permute.xlu2 %897 }
 0x20a   : > { %1208 = vmatpush.xpose.msk.msra.mxu3 %vm585_vm5, %v898_v45 }
 0x219   : > { %v665_v46 = vpop.permute.xlu1 %664 }
 0x21a   : > { %1199 = vmatpush.xpose.msk.msra.mxu0 %vm585_vm5, %v665_v46  ;;  %v791_v54 = vpop.permute.xlu0 %790 }
 0x21e   : > { %1204 = vmatpush.xpose.msk.msrb.mxu0 %vm585_vm5, %v793_v44 }
 0x221   : > { %v663_v48 = vpop.permute.xlu1 %662 }
 0x222   : > { %1200 = vmatmul.msk.f32.vlgmr.msra.gmra.mxu0 %vm585_vm5, %v663_v48 }
 0x228   : > { %v609_v51 = vpop.f32.mrf.mxu0 }
 0x229   : > { %v612_v55 = vmul.f32 0.17677669, %v609_v51  ;;  %v896_v56 = vpop.permute.xlu1 %895 }
 0x22a   : > { %1205 = vmatmul.msk.f32.vlgmr.msrb.gmra.mxu0 %vm585_vm5, %v791_v54  ;;  %1209 = vmatmul.msk.f32.vlgmr.msra.gmra.mxu3 %vm585_vm5, %v896_v56 }
 0x22b   : > { %v613_v57 = vadd.f32 %v612_v55, %v584_v53 }
 0x22d   : > { %v614_v58 = vsel %vm585_vm5, %v613_v57, -inf }
 0x22e   : > { %615 = vmax.xlane.f32.xlu2 %v614_v58 }
 0x29f   : > { %v687_v59 = vpop.f32.mrf.mxu0 }
 0x2a0   : > { %v690_v60 = vmul.f32 0.17677669, %v687_v59 }
 0x2a1   : > { %v616_v63 = vpop.xlane.xlu2 %615 }
 0x2a2   : > { %v691_v61 = vadd.f32 %v690_v60, %v584_v53  ;;  %v617_v3 = vsub.f32 %v613_v57, %v616_v63 }
 0x2a4   : > { %v692_v62 = vsel %vm585_vm5, %v691_v61, -inf  ;;  %v618_v6 = vmul.f32 1.442695, %v617_v3 }
 0x2a5   : > { %693 = vmax.xlane.f32.xlu1 %v692_v62 }
 0x2a6   : > { %1272 = vpow2.f32 %v618_v6 }
 0x2a7   : > { %v815_v1 = vpop.f32.mrf.mxu0 }
 0x2a8   : > { %v818_v2 = vmul.f32 0.17677669, %v815_v1 }
 0x2aa   : > { %v819_v4 = vadd.f32 %v818_v2, %v584_v53 }
 0x2ac   : > { %v820_v5 = vsel %vm585_vm5, %v819_v4, -inf  ;;  %v1273_v12 = vpop.eup %1272 }
 0x2ad   : > { %v920_v7 = vpop.f32.mrf.mxu3  ;;  %821 = vmax.xlane.f32.xlu0 %v820_v5  ;;  %v620_v13 = vsel %vm585_vm5, %v1273_v12, 0.0 }
 0x2ae   : > { %v923_v9 = vmul.f32 0.17677669, %v920_v7 }
 0x2b0   : > { %v924_v10 = vadd.f32 %v923_v9, %v584_v53 }
 0x2b2   : > { %v925_v11 = vsel %vm585_vm5, %v924_v10, -inf }
 0x2b3   : > { %926 = vmax.xlane.f32.xlu2 %v925_v11 }
 0x2bb   : > { %621 = vadd.xlane.f32.xlu2 %v620_v13 }
 0x318   : > { %v694_v14 = vpop.xlane.xlu1 %693 }
 0x319   : > { %v695_v15 = vsub.f32 %v691_v61, %v694_v14 }
 0x31b   : > { %v696_v16 = vmul.f32 1.442695, %v695_v15 }
 0x31d   : > { %1274 = vpow2.f32 %v696_v16 }
 0x320   : > { %v822_v17 = vpop.xlane.xlu0 %821 }
 0x321   : > { %v823_v18 = vsub.f32 %v819_v4, %v822_v17 }
 0x323   : > { %v1564_v19 = vpop.eup %1274  ;;  %v824_v20 = vmul.f32 1.442695, %v823_v18  ;;  %v743_v18 = vld [vmem:[%s1728_s4 + $0x8] sm:$0xff] }
 0x324   : > { %v698_v21 = vsel %vm585_vm5, %v1564_v19, 0.0  ;;  %762 = vmatpush.msrb.mxu2 %v743_v18 }
 0x325   : > { %1276 = vpow2.f32 %v824_v20  ;;  %699 = vadd.xlane.f32.xlu1 %v698_v21  ;;  %v975_v20 = vld [vmem:[%s1728_s4 + $0x18] sm:$0xff] }
 0x326   : > { %v927_v22 = vpop.xlane.xlu2 %926 }
 0x327   : > { %v928_v23 = vsub.f32 %v924_v10, %v927_v22  ;;  %v870_v22 = vld [vmem:[%s1728_s4 + $0x10] sm:$0xff] }
 0x329   : > { %v929_v24 = vmul.f32 1.442695, %v928_v23 }
 0x32b   : > { %v1568_v25 = vpop.eup %1276  ;;  %1278 = vpow2.f32 %v929_v24 }
 0x32c   : > { %v826_v26 = vsel %vm585_vm5, %v1568_v25, 0.0 }
 0x32d   : > { %827 = vadd.xlane.f32.xlu2 %v826_v26 }
 0x32e   : > { %v622_v27 = vpop.xlane.xlu2 %621 }
 0x32f   : > { %1280 = vrcp.f32 %v622_v27  ;;  %v634_v33 = vand.u32 2147483648, %v622_v27  ;;  %v632_v35 = vand.u32 2147483647, %v622_v27  ;;  %vm628_vm8 = vweird.f32 %v622_v27 }
 0x331   : > { %v1572_v28 = vpop.eup %1278  ;;  %v635_v37 = vor.u32 1.1754944e-38, %v634_v33  ;;  %vm633_vm10 = vcmp.eq.f32.partialorder %v632_v35, 8.507059e+37 }
 0x332   : > { %v931_v29 = vsel %vm585_vm5, %v1572_v28, 0.0 }
 0x333   : > { %932 = vadd.xlane.f32.xlu0 %v931_v29 }
 0x335   : > { %v1281_v30 = vpop.eup %1280 }
 0x336   : > { %v624_v31 = vmul.f32 %v1281_v30, %v622_v27  ;;  %vm629_vm7 = vweird.f32 %v1281_v30 }
 0x337   : > { %vm630_vm9 = vmor %vm628_vm8, %vm629_vm7 }
 0x338   : > { %v625_v32 = vsub.f32 1.0, %v624_v31  ;;  %v1263_v31 = vld [vmem:[%s1729_s5] ss:$0 sm:$0xff] }
 0x33a   : > { %v626_v34 = vmul.f32 %v1281_v30, %v625_v32 }
 0x33c   : > { %v627_v36 = vadd.f32 %v1281_v30, %v626_v34 }
 0x33e   : > { %717 = vrot.lane.b32.xlu1 %v1547_v43, %s1356_s22  ;;  %v631_v38 = vsel %vm630_vm9, %v1281_v30, %v627_v36  ;;  %s1214_s22 = sshll.u32 %s1455_s17, 3  ;;  %s1113_s17 = scalar_lea.sflag [#allocation3], %s456_s18 }
 0x33f   : > { %v636_v39 = vsel %vm633_vm10, %v635_v37, %v631_v38  ;;  %s1123_s26 = scalar_lea.hbm %s1738_s14, %s1214_s22 }
 0x340   : > { %v637_v40 = vmul.f32 %v1273_v12, %v636_v39  ;;  %s1127_s0 = sshll.u32 %s1123_s26, 4  ;;  %s1128_s0 = int_to_ptr.hbm [resolvable:$true] %s1127_s0 }
 0x341   : > { %s1304_s2 = sshra.s32 %s1128_s0, 4  ;;  %s1305_s2 = int_to_ptr.hbm [resolvable:$true] %s1304_s2 }
 0x342   : > { %1198 = vmatmul.msk.f32.vlgmr.msrb.gmra.mxu1 %vm585_vm5, %v637_v40  ;;  %p1311_p0 = scmp.lt.s32.totalorder %s1305_s2, %s1738_s14 }
 0x345   : > { %844 = vrot.lane.b32.xlu2 %v1547_v43, %s1355_s15  ;;  %s1191_s15 = sshll.u32 %s456_s18, 3 }
 0x346   : > { %s458_s27 = scalar_lea.vmem [#allocation2], %s1191_s15  ;;  %s1310_s15 = scalar_lea.hbm %s1738_s14, 16 }
 0x347   : > { %949 = vrot.lane.b32.xlu0 %v1547_v43, %s1357_s20  ;;  %s1125_s28 = sshll.u32 %s458_s27, 4  ;;  %s1306_s20 = scalar_lea.hbm %s1305_s2, 8  ;;  %s1126_s28 = int_to_ptr.vmem [resolvable:$true] %s1125_s28 }
 0x348   : > { %p1307_p11 = scmp.ne.s32.totalorder %s1305_s2, %s1306_s20  ;;  %p1312_p1 = scmp.lt.s32.totalorder %s1310_s15, %s1306_s20 }
 0x34a   : > { %p1308_p12 = pnand %p1307_p11, %p1472_p5  ;;  %p1313_p2 = por %p1312_p1, %p1311_p0 }
 0x34c   : > { %p1309_p13 = pneg %p1308_p12 }
 0x34e   : > { %p1314_p3 = pnand %p1313_p2, %p1309_p13 }
 0x398   : > { %v700_v41 = vpop.xlane.xlu1 %699 }
 0x399   : > { %1282 = vrcp.f32 %v700_v41  ;;  %v712_v51 = vand.u32 2147483648, %v700_v41  ;;  %vm706_vm12 = vweird.f32 %v700_v41  ;;  %v710_v52 = vand.u32 2147483647, %v700_v41 }
 0x39b   : > { %v713_v55 = vor.u32 1.1754944e-38, %v712_v51  ;;  %vm711_vm14 = vcmp.eq.f32.partialorder %v710_v52, 8.507059e+37  ;;  %v1082_v51 = vld [vmem:[%s1736_s12 + $0x60] sm:$0xff] }
 0x39f   : > { %v1283_v42 = vpop.eup %1282 }
 0x3a0   : > { %v702_v44 = vmul.f32 %v1283_v42, %v700_v41  ;;  %v828_v45 = vpop.xlane.xlu2 %827  ;;  %vm707_vm11 = vweird.f32 %v1283_v42 }
 0x3a1   : > { %1284 = vrcp.f32 %v828_v45  ;;  %vm708_vm13 = vmor %vm706_vm12, %vm707_vm11  ;;  %v840_v61 = vand.u32 2147483648, %v828_v45  ;;  %vm834_vm1 = vweird.f32 %v828_v45  ;;  %v838_v62 = vand.u32 2147483647, %v828_v45 }
 0x3a2   : > { %v703_v46 = vsub.f32 1.0, %v702_v44  ;;  %v1039_v44 = vld [vmem:[%s1734_s10 + $0x8] sm:$0xff] }
 0x3a3   : > { %v841_v9 = vor.u32 1.1754944e-38, %v840_v61  ;;  %vm839_vm4 = vcmp.eq.f32.partialorder %v838_v62, 8.507059e+37  ;;  %v1074_v62 = vld [vmem:[%s1736_s12 + $0x20] sm:$0xff] }
 0x3a4   : > { %v704_v47 = vmul.f32 %v1283_v42, %v703_v46  ;;  %v1085_v46 = vld [vmem:[%s1736_s12 + $0x78] sm:$0xff] }
 0x3a5   : > { %1090 = vmatpush.msrb.mxu3 %v1085_v46 }
 0x3a6   : > { %v705_v48 = vadd.f32 %v1283_v42, %v704_v47  ;;  %v933_v49 = vpop.xlane.xlu0 %932  ;;  %v1084_v47 = vld [vmem:[%s1736_s12 + $0x70] sm:$0xff] }
 0x3a7   : > { %v1285_v50 = vpop.eup %1284  ;;  %1286 = vrcp.f32 %v933_v49  ;;  %v945_v3 = vand.u32 2147483648, %v933_v49  ;;  %v943_v6 = vand.u32 2147483647, %v933_v49  ;;  %vm939_vm6 = vweird.f32 %v933_v49  ;;  %1091 = vmatpush.msrb.mxu3 %v1084_v47 }
 0x3a8   : > { %v830_v53 = vmul.f32 %v1285_v50, %v828_v45  ;;  %v709_v54 = vsel %vm708_vm13, %v1283_v42, %v705_v48  ;;  %vm835_vm15 = vweird.f32 %v1285_v50  ;;  %v845_v7 = vpop.permute.xlu2 %844  ;;  %v1041_v42 = vld [vmem:[%s1734_s10 + $0x18] sm:$0xff]  ;;  %v1038_v45 = vld [vmem:[%s1734_s10] sm:$0xff]  ;;  %v1083_v48 = vld [vmem:[%s1736_s12 + $0x68] sm:$0xff] }
 0x3a9   : > { %v714_v58 = vsel %vm711_vm14, %v713_v55, %v709_v54  ;;  %vm836_vm2 = vmor %vm834_vm1, %vm835_vm15  ;;  %v946_v12 = vor.u32 1.1754944e-38, %v945_v3  ;;  %vm944_vm8 = vcmp.eq.f32.partialorder %v943_v6, 8.507059e+37  ;;  %1092 = vmatpush.msrb.mxu3 %v1083_v48  ;;  %v1080_v54 = vld [vmem:[%s1736_s12 + $0x50] sm:$0xff]  ;;  %v1264_v3 = vld [vmem:[%s1732_s8] ss:$0 sm:$0xff] }
 0x3aa   : > { %v831_v43 = vsub.f32 1.0, %v830_v53  ;;  %v715_v2 = vmul.f32 %v1564_v19, %v714_v58  ;;  %v661_v19 = vld [vmem:[%s1728_s4] sm:$0xff]  ;;  %v1081_v53 = vld [vmem:[%s1736_s12 + $0x58] sm:$0xff]  ;;  %v1076_v58 = vld [vmem:[%s1736_s12 + $0x30] sm:$0xff] }
 0x3ab   : > { %785 = vmatpush.msra.mxu2 %v661_v19  ;;  %1093 = vmatpush.msrb.mxu3 %v1082_v51  ;;  %v1265_v6 = vld [vmem:[%s1733_s9] ss:$0 sm:$0xff] }
 0x3ac   : > { %v832_v56 = vmul.f32 %v1285_v50, %v831_v43  ;;  %v1078_v43 = vld [vmem:[%s1736_s12 + $0x40] sm:$0xff] }
 0x3ad   : > { %v1287_v57 = vpop.eup %1286  ;;  %1094 = vmatpush.msrb.mxu3 %v1081_v53 }
 0x3ae   : > { %v833_v59 = vadd.f32 %v1285_v50, %v832_v56  ;;  %v935_v60 = vmul.f32 %v1287_v57, %v933_v49  ;;  %vm940_vm3 = vweird.f32 %v1287_v57  ;;  %v1077_v56 = vld [vmem:[%s1736_s12 + $0x38] sm:$0xff] }
 0x3af   : > { %vm941_vm7 = vmor %vm939_vm6, %vm940_vm3  ;;  %1095 = vmatpush.msrb.mxu3 %v1080_v54 }
 0x3b0   : > { %v936_v63 = vsub.f32 1.0, %v935_v60  ;;  %v718_v1 = vpop.permute.xlu1 %717  ;;  %v837_v4 = vsel %vm836_vm2, %v1285_v50, %v833_v59  ;;  %v1075_v60 = vld [vmem:[%s1736_s12 + $0x28] sm:$0xff] }
 0x3b1   : > { %738 = vmatpush.msra.mxu1 %v718_v1  ;;  %v842_v11 = vsel %vm839_vm4, %v841_v9, %v837_v4  ;;  %v1073_v1 = vld [vmem:[%s1736_s12 + $0x18] sm:$0xff] }
 0x3b2   : > { %v937_v5 = vmul.f32 %v1287_v57, %v936_v63  ;;  %1201 = vmatmul.msk.f32.vlgmr.msra.gmra.mxu1 %vm585_vm5, %v715_v2  ;;  %v843_v15 = vmul.f32 %v1568_v25, %v842_v11  ;;  %v1071_v11 = vld [vmem:[%s1736_s12 + $0x8] sm:$0xff] }
 0x3b3   : > { %865 = vmatpush.msrb.mxu1 %v845_v7 }
 0x3b4   : > { %v938_v10 = vadd.f32 %v1287_v57, %v937_v5 }
 0x3b5   : > { %994 = vmatpush.msra.mxu1 %v975_v20 }
 0x3b6   : > { %v942_v13 = vsel %vm941_vm7, %v1287_v57, %v938_v10  ;;  %v1072_v10 = vld [vmem:[%s1736_s12 + $0x10] sm:$0xff] }
 0x3b7   : > { %v947_v14 = vsel %vm944_vm8, %v946_v12, %v942_v13  ;;  %v1070_v12 = vld [vmem:[%s1736_s12] sm:$0xff] }
 0x3b8   : > { %v948_v16 = vmul.f32 %v1572_v28, %v947_v14  ;;  %v1266_v13 = vld [vmem:[%s1735_s11] ss:$0 sm:$0xff] }
 0x3b9   : > { %v950_v17 = vpop.permute.xlu0 %949 }
 0x3ba   : > { %1206 = vmatmul.msk.f32.vlgmr.msrb.gmra.mxu1 %vm585_vm5, %v843_v15  ;;  %970 = vmatpush.msra.mxu0 %v950_v17  ;;  %v1267_v17 = vld [vmem:[%s1737_s13] ss:$0 sm:$0xff] }
 0x3bb   : > { %1210 = vmatmul.msk.f32.vlgmr.msra.gmra.mxu0 %vm585_vm5, %v948_v16 }
 0x3bf   : > { %v658_v21 = vpop.f32.mrf.mxu1 }
 0x42f   : > { %v740_v23 = vpop.f32.mrf.mxu1 }
 0x430   : > { %1202 = vmatmul.msk.f32.vlgmr.msrb.gmra.mxu2 %vm585_vm5, %v740_v23 }
 0x431   : > { %889 = vmatpush.msrb.mxu2 %v870_v22 }
 0x437   : > { %v867_v25 = vpop.f32.mrf.mxu1 }
 0x438   : > { %1203 = vmatmul.msk.f32.vlgmr.msra.gmra.mxu2 %vm585_vm5, %v658_v21  ;;  %v972_v24 = vpop.f32.mrf.mxu0 }
 0x439   : > { %1211 = vmatmul.msk.f32.vlgmr.msra.gmra.mxu1 %vm585_vm5, %v972_v24  ;;  %1061 = vmatpush.msra.mxu2 %v1041_v42 }
 0x440   : > { %1207 = vmatmul.msk.f32.vlgmr.msrb.gmra.mxu2 %vm585_vm5, %v867_v25 }
 0x4b3   : > { %v764_v26 = vpop.f32.mrf.mxu2 }
 0x4b6   : > { %v996_v32 = vpop.f32.mrf.mxu1 }
 0x4bb   : > { %v787_v27 = vpop.f32.mrf.mxu2 }
 0x4bc   : > { %v788_v28 = vadd.f32 %v787_v27, %v764_v26 }
 0x4c3   : > { %v891_v29 = vpop.f32.mrf.mxu2 }
 0x4c4   : > { %v894_v30 = vadd.f32 %v891_v29, %v788_v28 }
 0x4c6   : > { %v999_v33 = vadd.f32 %v996_v32, %v894_v30 }
 0x4c8   : > { %v1004_v34 = vadd.f32 %v1263_v31, %v999_v33 }
 0x4ca   : > { %v1609_v35 = vadd.f32 %v1004_v34, %v1487_v0  ;;  %v1040_v0 = vld [vmem:[%s1734_s10 + $0x10] sm:$0xff] }
 0x4cb   : > { %1062 = vmatpush.msra.mxu2 %v1040_v0 }
 0x4cc   : > { %v1008_v36 = vsel %vm466_vm0, %v1609_v35, 0.0 }
 0x4cd   : > { %1009 = vadd.xlane.f32.xlu1 %v1008_v36  ;;  %1063 = vmatpush.msra.mxu2 %v1039_v44 }
 0x4cf   : > { %1064 = vmatpush.msra.mxu2 %v1038_v45 }
 0x540   : > { %v1010_v37 = vpop.xlane.xlu1 %1009 }
 0x541   : > { %v1011_v38 = vmul.f32 %v1010_v37, %v1491_v8 }
 0x543   : > { %v1012_v39 = vsub.f32 %v1609_v35, %v1011_v38 }
 0x545   : > { %v1013_v40 = vmul.f32 %v1012_v39, %v1012_v39 }
 0x547   : > { %v1014_v41 = vsel %vm466_vm0, %v1013_v40, 0.0 }
 0x548   : > { %1015 = vadd.xlane.f32.xlu2 %v1014_v41 }
 0x5bb   : > { %v1016_v49 = vpop.xlane.xlu2 %1015 }
 0x5bc   : > { %v1017_v50 = vmul.f32 %v1016_v49, %v1491_v8  ;;  %v1079_v8 = vld [vmem:[%s1736_s12 + $0x48] sm:$0xff] }
 0x5bd   : > { %1096 = vmatpush.msrb.mxu3 %v1079_v8 }
 0x5be   : > { %v1018_v52 = vadd.f32 1e-05, %v1017_v50 }
 0x5bf   : > { %1097 = vmatpush.msrb.mxu3 %v1078_v43 }
 0x5c0   : > { %1288 = vrsqrt.f32 %v1018_v52  ;;  %vm1025_vm9 = vweird.f32 %v1018_v52 }
 0x5c1   : > { %1098 = vmatpush.msrb.mxu3 %v1077_v56 }
 0x5c3   : > { %1099 = vmatpush.msrb.mxu3 %v1076_v58 }
 0x5c5   : > { %1100 = vmatpush.msrb.mxu3 %v1075_v60 }
 0x5c6   : > { %v1289_v55 = vpop.eup %1288 }
 0x5c7   : > { %v1020_v57 = vmul.f32 %v1289_v55, %v1018_v52  ;;  %vm1026_vm5 = vweird.f32 %v1289_v55  ;;  %1101 = vmatpush.msrb.mxu3 %v1074_v62 }
 0x5c8   : > { %vm1027_vm10 = vmor %vm1025_vm9, %vm1026_vm5 }
 0x5c9   : > { %v1021_v59 = vmul.f32 %v1289_v55, %v1020_v57  ;;  %1102 = vmatpush.msrb.mxu3 %v1073_v1 }
 0x5cb   : > { %v1022_v61 = vmul.f32 0.5, %v1021_v59  ;;  %1103 = vmatpush.msrb.mxu3 %v1072_v10 }
 0x5cd   : > { %v1023_v63 = vsub.f32 1.5, %v1022_v61  ;;  %1104 = vmatpush.msrb.mxu3 %v1071_v11 }
 0x5cf   : > { %v1024_v2 = vmul.f32 %v1289_v55, %v1023_v63  ;;  %1105 = vmatpush.msrb.mxu3 %v1070_v12 }
 0x5d1   : > { %v1028_v4 = vsel %vm1027_vm10, %v1289_v55, %v1024_v2 }
 0x5d2   : > { %v1029_v5 = vmul.f32 %v1028_v4, %v1012_v39 }
 0x5d4   : > { %v1033_v7 = vmul.f32 %v1264_v3, %v1029_v5 }
 0x5d6   : > { %v1037_v9 = vadd.f32 %v1265_v6, %v1033_v7 }
 0x5d8   : > { %1212 = vmatmul.msk.f32.vlgmr.msra.gmra.mxu2 %vm466_vm0, %v1037_v9 }
 0x65b   : > { %v1066_v14 = vpop.f32.mrf.mxu2 }
 0x65c   : > { %v1067_v15 = vadd.f32 %v1266_v13, %v1066_v14 }
 0x65e   : > { %v1069_v16 = vmax.f32 %v1067_v15, 0.0 }
 0x660   : > { %1106 = vmatmul.f32.vlgmr.msrb.gmra.mxu3 %v1069_v16 }
 0x6e3   : > { %v1107_v18 = vpop.f32.mrf.mxu3 }
 0x6e4   : > { %v1108_v19 = vadd.f32 %v1267_v17, %v1107_v18 }
 0x6e6   : > { %v1110_v20 = vadd.f32 %v1108_v19, %v1609_v35 }
 0x6e8   : > { %1111 = vst.msk [vmem:[%s458_s27] sm:$0xff] %vm466_vm0, %v1110_v20 }
 0x6e9   : > { %1317 = shalt.err (!%p1314_p3)
}
 0x6ea   : > { %1217 = dma.vmem_to_hbm [thread:$0]  (%p1472_p5), %s1126_s28, 128, %s1128_s0, %s1113_s17  }
 0x6eb PF: > { %p1223_p4 = scmp.ge.s32.totalorder %s1352_s16, 2  ;;  %s1139_s18 = sand.u32 1, %s1340_s29  }
 0x6ec   : > { %s1140_s26 = scalar_lea.sflag [#allocation3], %s1139_s18 }
 0x6ed   : > { %p1220_p7 = pnand %p1223_p4, %p1476_p6 }
 0x6ef   : > { %p1221_p8 = pneg %p1220_p7 }
 0x6f1   : > { %1335 = dma.done.wait (%p1221_p8), %s1140_s26, 128  }
 0x6f2   : > { %1337 = vsyncadd (%p1221_p8), %s1140_s26, 4294967168  ;;  %s1750_s2 = sld [smem:[#allocation5_spill]]  ;;  %p24_p9 = scmp.ge.s32.totalorder %s1459_s19, 4  }
 0x6f3   : > { %s1751_s15 = sld [smem:[#allocation6_spill]]  ;;  %s1752_s29 = smov %s1344_s30 }
 0x6f4   : > { %s1754_s16 = smov %s1459_s19  ;;  %26 = sbr.rel (!%p24_p9) target bundleno = 7 (0x7), region = 111 }
 0x6f8   : > { %s1753_s30 = smov %s1750_s2 }
 0x6f9   :  { %1146 = vsyncpa [#allocation3], 1 }
 0x6fa   :  { %1148 = vsyncpa [#allocation3 + $0x1], 1 }

</bundles_post_ra>
